<compile_context>
chip_gen: v7x
topology: tpu7x:2x2x1
jax: 0.10.0
libtpu: 0.0.40
codegen_flags: <defaults>
</compile_context>

<pallas_src>
import jax
import jax.numpy as jnp
import numpy as np
from jax.experimental import pallas as pl
from jax.experimental.pallas import tpu as pltpu

# ---- config (mirrors config.input_len / pred_len; var_len/out_dim unused in forward) ----
INPUT_LEN = 16                 # config.input_len  (seq_len)
PRED_LEN = 8                   # config.pred_len
HIDDEN = 2 * INPUT_LEN         # fc1 output width
BATCH = 512                    # batched so the grid amortizes per-step overhead
BLOCK_B = 128                  # rows per grid step


def ann_kernel(x_ref, w_ref, b_ref, o_ref):
    # Single fused affine layer: (BM, L) @ (L, H) + (1, H)
    o_ref[...] = (
        jnp.dot(x_ref[...], w_ref[...], preferred_element_type=jnp.float32)
        + b_ref[...]
    ).astype(o_ref.dtype)


def fold_params(params):
    """Fold fc1/fc2/fc3 (no activation in forward) into one (L, H) weight + (1, H) bias."""
    W1, b1, W2, b2, W3, b3 = params          # torch Linear convention: (out, in)
    w_c = W1.T @ W2.T @ W3.T                 # (L, 2L) @ (2L, L) @ (L, H) -> (L, H)
    b_c = (b1 @ W2.T + b2) @ W3.T + b3       # (H,)
    return w_c.astype(jnp.float32), b_c.reshape(1, -1).astype(jnp.float32)


def ann_forward(x, folded_params, *, block_b=BLOCK_B):
    w_c, b_c = folded_params                 # (L, H), (1, H)
    B, L = x.shape
    H = w_c.shape[1]
    assert B % block_b == 0, "batch must be a multiple of the batch block"

    out = pl.pallas_call(
        ann_kernel,
        out_shape=jax.ShapeDtypeStruct((B, H), jnp.float32),
        grid=(B // block_b,),
        in_specs=[
            pl.BlockSpec((block_b, L), lambda i: (i, 0)),   # x tile
            pl.BlockSpec((L, H), lambda i: (0, 0)),         # folded weight (resident)
            pl.BlockSpec((1, H), lambda i: (0, 0)),         # folded bias (resident)
        ],
        out_specs=pl.BlockSpec((block_b, H), lambda i: (i, 0)),
        compiler_params=pltpu.CompilerParams(
            dimension_semantics=("parallel",)),             # v7x: both TCs get batch tiles
    )(x.astype(jnp.float32), w_c, b_c)
    # torch.squeeze(out) is a no-op here (B > 1, H > 1)
    return out


def init_params(key):
    """torch.nn.Linear default init: U(-1/sqrt(fan_in), 1/sqrt(fan_in)) for W and b."""
    L, H, M = INPUT_LEN, PRED_LEN, HIDDEN
    ks = jax.random.split(key, 6)

    def lin(kw, kb, out_f, in_f):
        bound = 1.0 / np.sqrt(in_f)
        W = jax.random.uniform(kw, (out_f, in_f), jnp.float32, -bound, bound)
        b = jax.random.uniform(kb, (out_f,), jnp.float32, -bound, bound)
        return W, b

    W1, b1 = lin(ks[0], ks[1], M, L)     # fc1: L  -> 2L
    W2, b2 = lin(ks[2], ks[3], L, M)     # fc2: 2L -> L
    W3, b3 = lin(ks[4], ks[5], H, L)     # fc3: L  -> H
    return W1, b1, W2, b2, W3, b3


def ann_reference(x, params):
    """Pure-JAX reference mirroring the PyTorch forward layer-by-layer."""
    W1, b1, W2, b2, W3, b3 = params
    h1 = x @ W1.T + b1                   # fc1
    h2 = h1 @ W2.T + b2                  # fc2
    y = h2 @ W3.T + b3                   # fc3
    return jnp.squeeze(y)                # no-op for these shapes


if __name__ == "__main__":
    key = jax.random.PRNGKey(0)
    kx, kp = jax.random.split(key)
    x = jax.random.normal(kx, (BATCH, INPUT_LEN), dtype=jnp.float32)
    params = init_params(kp)

    folded = fold_params(params)
    out = ann_forward(x, folded)
    out = jax.block_until_ready(out)

    ref = ann_reference(x, params)
    assert out.shape == (BATCH, PRED_LEN)
    np.testing.assert_allclose(np.asarray(out), np.asarray(ref), rtol=1e-4, atol=1e-4)
    print("KERNEL_OK")
</pallas_src>

<mosaic_0001>
module attributes {stable_mosaic.version = 11 : i64} {
  func.func @ann_kernel(%arg0: i32, %arg1: memref<128x16xf32, #tpu.memory_space<vmem>>, %arg2: memref<16x8xf32, #tpu.memory_space<vmem>>, %arg3: memref<1x8xf32, #tpu.memory_space<vmem>>, %arg4: memref<128x8xf32, #tpu.memory_space<vmem>>) attributes {dimension_semantics = [#tpu.dimension_semantics<parallel>], iteration_bounds = array<i64: 4>, scalar_prefetch = 0 : i64, scratch_operands = 0 : i64, tpu.core_type = #tpu.core_type<tc>, window_params = [{transform_indices = @transform_0, window_bounds = array<i64: 128, 16>}, {pipeline_mode = #tpu.pipeline_mode<synchronous>, transform_indices = @transform_1, window_bounds = array<i64: 16, 8>}, {pipeline_mode = #tpu.pipeline_mode<synchronous>, transform_indices = @transform_2, window_bounds = array<i64: 1, 8>}, {transform_indices = @transform_3, window_bounds = array<i64: 128, 8>}]} {
    %c0 = arith.constant 0 : index
    %c0_0 = arith.constant 0 : index
    %0 = vector.load %arg1[%c0, %c0_0] : memref<128x16xf32, #tpu.memory_space<vmem>>, vector<128x16xf32>
    %c0_1 = arith.constant 0 : index
    %c0_2 = arith.constant 0 : index
    %1 = vector.load %arg2[%c0_1, %c0_2] : memref<16x8xf32, #tpu.memory_space<vmem>>, vector<16x8xf32>
    %cst = arith.constant dense<0.000000e+00> : vector<128x8xf32>
    %2 = tpu.matmul %0, %1, %cst {dimension_numbers = #tpu.dot_dimension_numbers<[1], [0], [0], [1], [0, 0, 1, 1], [], []>} : vector<128x16xf32>, vector<16x8xf32>, vector<128x8xf32> -> vector<128x8xf32>
    %c0_3 = arith.constant 0 : index
    %c0_4 = arith.constant 0 : index
    %3 = vector.load %arg3[%c0_3, %c0_4] : memref<1x8xf32, #tpu.memory_space<vmem>>, vector<1x8xf32>
    %4 = vector.broadcast %3 : vector<1x8xf32> to vector<128x8xf32>
    %5 = arith.addf %2, %4 : vector<128x8xf32>
    %c0_5 = arith.constant 0 : index
    %c0_6 = arith.constant 0 : index
    %6 = vector.load %arg4[%c0_5, %c0_6] : memref<128x8xf32, #tpu.memory_space<vmem>>, vector<128x8xf32>
    tpu.vector_store %arg4[%c0_5, %c0_6], %5 {strides = array<i32>} : memref<128x8xf32, #tpu.memory_space<vmem>>, vector<128x8xf32>,
    return
  }
  func.func @transform_0(%arg0: i32) -> (i32, i32) {
    %c0_i32 = arith.constant 0 : i32
    %c0_i32_0 = arith.constant 0 : i32
    return %arg0, %c0_i32 : i32, i32
  }
  func.func @transform_1(%arg0: i32) -> (i32, i32) {
    %c0_i32 = arith.constant 0 : i32
    %c0_i32_0 = arith.constant 0 : i32
    %c0_i32_1 = arith.constant 0 : i32
    return %c0_i32, %c0_i32_0 : i32, i32
  }
  func.func @transform_2(%arg0: i32) -> (i32, i32) {
    %c0_i32 = arith.constant 0 : i32
    %c0_i32_0 = arith.constant 0 : i32
    %c0_i32_1 = arith.constant 0 : i32
    return %c0_i32, %c0_i32_0 : i32, i32
  }
  func.func @transform_3(%arg0: i32) -> (i32, i32) {
    %c0_i32 = arith.constant 0 : i32
    %c0_i32_0 = arith.constant 0 : i32
    return %arg0, %c0_i32 : i32, i32
  }
}

</mosaic_0001>

<bundles_post_ra>
// kernel: tpu_custom_call.1
= control target key start
LH: loop header
LB: loop body
LE: loop exit
PB: predicated region body
PF: predicated region fallthrough
CT: control target
= control target key end

     0   :  { %s582_s12 = smov 0   ;;  %s665_s0 = inlined_call_operand.vmem [shape: f32[512,16], index: 0, kind: input, shape index: {}]   ;;  %s666_s1 = inlined_call_operand.vmem [shape: f32[16,8], index: 1, kind: input, shape index: {}]   ;;  %s667_s2 = inlined_call_operand.vmem [shape: f32[1,8], index: 2, kind: input, shape index: {}]   ;;  %s668_s3 = inlined_call_operand.vmem [shape: f32[512,8], index: 3, kind: output, shape index: {}]  }
   0x1 LB: > { %s466_s13 = sadd.s32 4294967295, %s560_s12   ;;  %p470_p0 = scmp.ge.s32.totalorder %s560_s12, 1  ;;  %s560_s12 = sphi %s582_s12, %s13_s12  }
   0x2   : > { %p138_p1 = scmp.lt.s32.totalorder %s560_s12, 5 }
   0x4   : > { %p139_p2 = pnand %p470_p0, %p138_p1 }
   0x5   : > { %v190_v0 = vld [vmem:[%s666_s1] sm:$0xff] (!%p139_p2)  ;;  %v191_v1 = vld [vmem:[%s666_s1 + $0x8] sm:$0xff] (!%p139_p2)  ;;  %s471_s18 = sshll.u32 (!%p139_p2), %s466_s13, 4  ;;  %vm199_vm0 = vcmask (!%p139_p2), 130048   ;;  %vm393_vm1 = vcmask (!%p139_p2), 64512  }
   0x6   : > { %142 = sbr.rel (%p139_p2) target bundleno = 247 (0xf7), region = 32  ;;  %v540_v2 = vpack.c.bf16 (!%p139_p2), %v191_v1, %v190_v0  ;;  %p163_p3 = scmp.lt.s32.totalorder (!%p139_p2), %s471_s18, 63  ;;  %v475_v19 = vld [vmem:[%s667_s2] ss:$0 sm:$0xff] (!%p139_p2) }
   0x8   : > { %541 = vmatprep.subr.bf16.mxu0 (!%p139_p2), %v540_v2  ;;  %544 = vmatprep.subr.bf16.mxu1 (!%p139_p2), %v540_v2 }
   0x9   : > { %543 = vmatpush3.bf16.msra.mxu0 (!%p139_p2), %v540_v2  ;;  %545 = vmatpush3.bf16.msra.mxu1 (!%p139_p2), %v540_v2 }
   0xd   : > { %s670_s18 = smov (!%p163_p3, %s471_s18), 63 }
   0xe   : > { %s472_s19 = sshll.u32 %s670_s18, 3 }
   0xf   : > { %s166_s22 = scalar_lea.vmem %s665_s0, %s472_s19  ;;  %s628_s27 = scalar_lea.vmem %s668_s3, %s472_s19 }
  0x10   : > { %v174_v3 = vld [vmem:[%s166_s22] sm:$0xff]  ;;  %v175_v5 = vld [vmem:[%s166_s22 + $0x8] sm:$0xff]  ;;  %v176_v7 = vld [vmem:[%s166_s22 + $0x10] sm:$0xff] }
  0x11   : > { %v182_v4 = vld [vmem:[%s166_s22 + $0x40] sm:$0xff]  ;;  %516 = vmatprep.mubr.msk.f32.mxu0 %vm199_vm0, %v174_v3  ;;  %v183_v6 = vld [vmem:[%s166_s22 + $0x48] sm:$0xff]  ;;  %v184_v8 = vld [vmem:[%s166_s22 + $0x50] sm:$0xff] }
  0x12   : > { %528 = vmatprep.mubr.msk.f32.mxu1 %vm199_vm0, %v182_v4  ;;  %517 = vmatmul.mubr.msk.f32.vlgmr.msra.gmra.mrb[0].mxu0 %vm199_vm0, %v175_v5  ;;  %v177_v9 = vld [vmem:[%s166_s22 + $0x18] sm:$0xff]  ;;  %v178_v11 = vld [vmem:[%s166_s22 + $0x20] sm:$0xff]  ;;  %v179_v13 = vld [vmem:[%s166_s22 + $0x28] sm:$0xff] }
  0x13   : > { %529 = vmatmul.mubr.msk.f32.vlgmr.msra.gmra.mrb[0].mxu1 %vm199_vm0, %v183_v6  ;;  %519 = vmatprep.mubr.msk.f32.mxu0 %vm199_vm0, %v176_v7  ;;  %v185_v10 = vld [vmem:[%s166_s22 + $0x58] sm:$0xff]  ;;  %v186_v12 = vld [vmem:[%s166_s22 + $0x60] sm:$0xff]  ;;  %v187_v14 = vld [vmem:[%s166_s22 + $0x68] sm:$0xff] }
  0x14   : > { %531 = vmatprep.mubr.msk.f32.mxu1 %vm199_vm0, %v184_v8  ;;  %v180_v15 = vld [vmem:[%s166_s22 + $0x30] sm:$0xff]  ;;  %v181_v17 = vld [vmem:[%s166_s22 + $0x38] sm:$0xff] }
  0x15   : > { %v188_v16 = vld [vmem:[%s166_s22 + $0x70] sm:$0xff]  ;;  %v189_v18 = vld [vmem:[%s166_s22 + $0x78] sm:$0xff] }
  0x16   : > { %520 = vmatmul.mubr.msk.f32.gmra.mrb[2].mxu0 %vm199_vm0, %v177_v9 }
  0x17   : > { %532 = vmatmul.mubr.msk.f32.gmra.mrb[2].mxu1 %vm199_vm0, %v185_v10  ;;  %522 = vmatprep.mubr.msk.f32.mxu0 %vm199_vm0, %v178_v11 }
  0x18   : > { %534 = vmatprep.mubr.msk.f32.mxu1 %vm199_vm0, %v186_v12 }
  0x1a   : > { %523 = vmatmul.mubr.msk.f32.gmra.mrb[4].mxu0 %vm199_vm0, %v179_v13 }
  0x1b   : > { %535 = vmatmul.mubr.msk.f32.gmra.mrb[4].mxu1 %vm199_vm0, %v187_v14  ;;  %525 = vmatprep.mubr.msk.f32.mxu0 %vm199_vm0, %v180_v15 }
  0x1c   : > { %537 = vmatprep.mubr.msk.f32.mxu1 %vm199_vm0, %v188_v16 }
  0x1e   : > { %526 = vmatmul.mubr.msk.f32.gmra.mrb[6].mxu0 %vm199_vm0, %v181_v17 }
  0x1f   : > { %538 = vmatmul.mubr.msk.f32.gmra.mrb[6].mxu1 %vm199_vm0, %v189_v18 }
  0xe5   : > { %v518_v20 = vpop.f32.mrb[0].mxu0 }
  0xe6   : > { %v530_v21 = vpop.f32.mrb[0].mxu1  ;;  %v320_v22 = vadd.f32 %v518_v20, %v475_v19  ;;  %v314_v24 = vpop.f32.mrb[1].mxu0 }
  0xe7   : > { %v360_v23 = vadd.f32 %v530_v21, %v475_v19  ;;  %v354_v25 = vpop.f32.mrb[1].mxu1  ;;  %v315_v26 = vadd.f32 %v475_v19, %v314_v24 }
  0xe8   : > { %v355_v27 = vadd.f32 %v475_v19, %v354_v25  ;;  %395 = vst.msk [vmem:[%s628_s27 + $0x8] sm:$0xff] %vm393_vm1, %v320_v22 }
  0xe9   : > { %403 = vst.msk [vmem:[%s628_s27 + $0x48] sm:$0xff] %vm393_vm1, %v360_v23  ;;  %394 = vst.msk [vmem:[%s628_s27] sm:$0xff] %vm393_vm1, %v315_v26  ;;  %v521_v28 = vpop.f32.mrb[2].mxu0 }
  0xea   : > { %402 = vst.msk [vmem:[%s628_s27 + $0x40] sm:$0xff] %vm393_vm1, %v355_v27  ;;  %v533_v29 = vpop.f32.mrb[2].mxu1  ;;  %v330_v30 = vadd.f32 %v521_v28, %v475_v19  ;;  %v324_v32 = vpop.f32.mrb[3].mxu0 }
  0xeb   : > { %v370_v31 = vadd.f32 %v533_v29, %v475_v19  ;;  %v364_v33 = vpop.f32.mrb[3].mxu1  ;;  %v325_v34 = vadd.f32 %v475_v19, %v324_v32 }
  0xec   : > { %v365_v35 = vadd.f32 %v475_v19, %v364_v33  ;;  %397 = vst.msk [vmem:[%s628_s27 + $0x18] sm:$0xff] %vm393_vm1, %v330_v30 }
  0xed   : > { %405 = vst.msk [vmem:[%s628_s27 + $0x58] sm:$0xff] %vm393_vm1, %v370_v31  ;;  %396 = vst.msk [vmem:[%s628_s27 + $0x10] sm:$0xff] %vm393_vm1, %v325_v34  ;;  %v524_v36 = vpop.f32.mrb[4].mxu0 }
  0xee   : > { %404 = vst.msk [vmem:[%s628_s27 + $0x50] sm:$0xff] %vm393_vm1, %v365_v35  ;;  %v536_v37 = vpop.f32.mrb[4].mxu1  ;;  %v340_v38 = vadd.f32 %v524_v36, %v475_v19  ;;  %v334_v40 = vpop.f32.mrb[5].mxu0 }
  0xef   : > { %v380_v39 = vadd.f32 %v536_v37, %v475_v19  ;;  %v374_v41 = vpop.f32.mrb[5].mxu1  ;;  %v335_v42 = vadd.f32 %v475_v19, %v334_v40 }
  0xf0   : > { %v375_v43 = vadd.f32 %v475_v19, %v374_v41  ;;  %399 = vst.msk [vmem:[%s628_s27 + $0x28] sm:$0xff] %vm393_vm1, %v340_v38 }
  0xf1   : > { %407 = vst.msk [vmem:[%s628_s27 + $0x68] sm:$0xff] %vm393_vm1, %v380_v39  ;;  %398 = vst.msk [vmem:[%s628_s27 + $0x20] sm:$0xff] %vm393_vm1, %v335_v42  ;;  %v527_v44 = vpop.f32.mrb[6].mxu0 }
  0xf2   : > { %406 = vst.msk [vmem:[%s628_s27 + $0x60] sm:$0xff] %vm393_vm1, %v375_v43  ;;  %v539_v45 = vpop.f32.mrb[6].mxu1  ;;  %v350_v46 = vadd.f32 %v527_v44, %v475_v19  ;;  %v344_v48 = vpop.f32.mrb[7].mxu0 }
  0xf3   : > { %v390_v47 = vadd.f32 %v539_v45, %v475_v19  ;;  %v384_v49 = vpop.f32.mrb[7].mxu1  ;;  %v345_v50 = vadd.f32 %v475_v19, %v344_v48 }
  0xf4   : > { %v385_v51 = vadd.f32 %v475_v19, %v384_v49  ;;  %401 = vst.msk [vmem:[%s628_s27 + $0x38] sm:$0xff] %vm393_vm1, %v350_v46 }
  0xf5   : > { %409 = vst.msk [vmem:[%s628_s27 + $0x78] sm:$0xff] %vm393_vm1, %v390_v47  ;;  %400 = vst.msk [vmem:[%s628_s27 + $0x30] sm:$0xff] %vm393_vm1, %v345_v50 }
  0xf6   : > { %408 = vst.msk [vmem:[%s628_s27 + $0x70] sm:$0xff] %vm393_vm1, %v385_v51 }
  0xf7 PF: > { %s13_s12 = sadd.s32 1, %s560_s12  }
  0xf8   : > { %p10_p4 = scmp.ge.s32.totalorder %s13_s12, 6  }
  0xfa   :  { %12 = sbr.rel (!%p10_p4) target bundleno = 1 (0x1), region = 62 }

</bundles_post_ra>
